<compile_context>
chip_gen: v6e
topology: v6e:2x2x1
jax: 0.10.0
libtpu: 0.0.40
codegen_flags: <defaults>
</compile_context>

<pallas_src>
import jax
import jax.numpy as jnp
from jax import lax
from jax.experimental import pallas as pl
from jax.experimental.pallas import tpu as pltpu

NEG_SLOPE = 0.01   # nn.LeakyReLU default
BN_EPS = 1e-5      # nn.BatchNorm2d default


def _leaky_relu(x):
    return jnp.where(x > 0, x, NEG_SLOPE * x)


# ------------------ Kernel 1: Linear + LeakyReLU (tiled over N=4096) ------------------
def fc_kernel(z_ref, w_ref, b_ref, o_ref):
    y = jnp.dot(z_ref[...], w_ref[...], preferred_element_type=jnp.float32)
    o_ref[...] = _leaky_relu(y + b_ref[...])


def fc_leakyrelu(z, w, b, *, col_tile=2048):
    B, L = z.shape
    N = w.shape[1]
    assert N % col_tile == 0
    return pl.pallas_call(
        fc_kernel,
        out_shape=jax.ShapeDtypeStruct((B, N), jnp.float32),
        grid_spec=pltpu.PrefetchScalarGridSpec(
            num_scalar_prefetch=0,
            grid=(N // col_tile,),
            in_specs=[
                pl.BlockSpec((B, L), lambda i: (0, 0)),
                pl.BlockSpec((L, col_tile), lambda i: (0, i)),
                pl.BlockSpec((1, col_tile), lambda i: (0, i)),
            ],
            out_specs=pl.BlockSpec((B, col_tile), lambda i: (0, i)),
        ),
        compiler_params=pltpu.CompilerParams(dimension_semantics=("parallel",)),
    )(z, w, b)


# ------ Kernel 2: packed 3x3 conv (single matmul, K=576) + BatchNorm + LeakyReLU ------
def conv_bn_lrelu_kernel(w_ref, x_ref, g_ref, beta_ref, o_ref):
    # (Co, 9*Ci) @ (9*Ci, rows) -> (Co, rows), f32 accumulation on the MXU.
    acc = jnp.dot(w_ref[...], x_ref[...], preferred_element_type=jnp.float32)
    # BatchNorm2d training-mode biased stats over (N, H, W) == the rows (lane) axis.
    # Conv bias is intentionally omitted: it cancels exactly under mean subtraction.
    mean = jnp.mean(acc, axis=1, keepdims=True)
    mean_sq = jnp.mean(acc * acc, axis=1, keepdims=True)
    var = jnp.maximum(mean_sq - mean * mean, 0.0)
    y = (acc - mean) * (lax.rsqrt(var + BN_EPS) * g_ref[...]) + beta_ref[...]
    o_ref[...] = _leaky_relu(y).astype(o_ref.dtype)


def conv_bn_lrelu(w_t, x_cols, gamma, beta):
    co = w_t.shape[0]
    rows = x_cols.shape[1]
    return pl.pallas_call(
        conv_bn_lrelu_kernel,
        out_shape=jax.ShapeDtypeStruct((co, rows), jnp.bfloat16),
        in_specs=[pl.BlockSpec(memory_space=pltpu.MemorySpace.VMEM)] * 4,
        out_specs=pl.BlockSpec(memory_space=pltpu.MemorySpace.VMEM),
    )(w_t, x_cols, gamma, beta)


# ------ Kernel 3: packed 3x3 conv (single matmul, K=288) + bias + Sigmoid, lane-dense ------
def conv_sigmoid_kernel(w_ref, x_ref, b_ref, o_ref):
    acc = jnp.dot(w_ref[...], x_ref[...], preferred_element_type=jnp.float32)
    o_ref[...] = jax.nn.sigmoid(acc + b_ref[...])


def conv_sigmoid(w_t, x_cols, b, *, row_tile):
    co, K = w_t.shape
    rows = x_cols.shape[1]
    assert rows % row_tile == 0
    return pl.pallas_call(
        conv_sigmoid_kernel,
        out_shape=jax.ShapeDtypeStruct((co, rows), jnp.float32),
        grid_spec=pltpu.PrefetchScalarGridSpec(
            num_scalar_prefetch=0,
            grid=(rows // row_tile,),
            in_specs=[
                pl.BlockSpec((co, K), lambda i: (0, 0)),
                pl.BlockSpec((K, row_tile), lambda i: (0, i)),
                pl.BlockSpec((co, 1), lambda i: (0, 0)),
            ],
            out_specs=pl.BlockSpec((co, row_tile), lambda i: (0, i)),
        ),
        compiler_params=pltpu.CompilerParams(dimension_semantics=("parallel",)),
    )(w_t, x_cols, b)


# ------------------------------ Glue (plain JAX) ------------------------------
def upsample2x(x, hw_axes=(1, 2)):
    # nn.Upsample(scale_factor=2, mode='nearest') along the given spatial axes.
    for a in hw_axes:
        x = jnp.repeat(x, 2, axis=a)
    return x


def im2col_3x3_chwb(x):
    # x: (C, H, W, B), padding=1 -> packed, transposed im2col columns (9*C, H*W*B).
    # Row index k*C + c matches the weight packing w.transpose(3,0,1,2).reshape(Co, 9*Ci).
    C, H, W, B = x.shape
    xp = jnp.pad(x, ((0, 0), (1, 1), (1, 1), (0, 0)))
    cols = [xp[:, dy:dy + H, dx:dx + W, :].reshape(C, H * W * B)
            for dy in range(3) for dx in range(3)]
    return jnp.concatenate(cols, axis=0)


def init_params(key, n_latent):
    # PyTorch-layout parameters (f32), used directly by the pure-JAX reference.
    ks = jax.random.split(key, 6)
    p = {}
    p["fc_w"] = jax.random.normal(ks[0], (n_latent, 64 * 8 * 8), jnp.float32) / jnp.sqrt(n_latent)
    p["fc_b"] = jax.random.normal(ks[1], (64 * 8 * 8,), jnp.float32) * 0.01
    p["c1_w"] = jax.random.normal(ks[2], (3, 3, 64, 32), jnp.float32) / jnp.sqrt(9 * 64)  # HWIO
    p["c1_b"] = jax.random.normal(ks[3], (32,), jnp.float32) * 0.01
    p["bn_g"] = jnp.ones((32,), jnp.float32)    # BatchNorm2d init: weight=1
    p["bn_b"] = jnp.zeros((32,), jnp.float32)   # BatchNorm2d init: bias=0
    p["c2_w"] = jax.random.normal(ks[4], (3, 3, 32, 3), jnp.float32) / jnp.sqrt(9 * 32)   # HWIO
    p["c2_b"] = jax.random.normal(ks[5], (3,), jnp.float32) * 0.01
    return p


def prepare_params(p):
    # One-time weight repack for the kernels: taps folded into K, bf16 matmul operands.
    kp = {}
    kp["fc_w"] = p["fc_w"].astype(jnp.bfloat16)
    kp["fc_b"] = p["fc_b"].reshape(1, -1)
    kp["w1t"] = p["c1_w"].transpose(3, 0, 1, 2).reshape(32, 9 * 64).astype(jnp.bfloat16)
    # c1_b intentionally NOT packed: a conv bias followed by BatchNorm mean-subtraction
    # cancels exactly, so the kernel skips it.
    kp["bn_g"] = p["bn_g"].reshape(32, 1)
    kp["bn_b"] = p["bn_b"].reshape(32, 1)
    kp["w2t"] = p["c2_w"].transpose(3, 0, 1, 2).reshape(3, 9 * 32).astype(jnp.bfloat16)
    kp["c2_b"] = p["c2_b"].reshape(3, 1)
    return kp


def generator_forward(kp, z):
    B = z.shape[0]
    # fc + LeakyReLU  -> (B, 4096) f32
    x = fc_leakyrelu(z.astype(jnp.bfloat16), kp["fc_w"], kp["fc_b"])
    # to channels-first (C, H, W, B) layout; all conv rows (= H*W*B) become the lane axis
    x = x.reshape(B, 64, 8, 8).transpose(1, 2, 3, 0).astype(jnp.bfloat16)   # (64, 8, 8, B)
    # Upsample x2 -> conv1 + BN + LeakyReLU
    x = upsample2x(x)                                                       # (64, 16, 16, B)
    cols1 = im2col_3x3_chwb(x)                                              # (576, 256*B) bf16
    y1 = conv_bn_lrelu(kp["w1t"], cols1, kp["bn_g"], kp["bn_b"])            # (32, 256*B) bf16
    x = y1.reshape(32, 16, 16, B)
    # Upsample x2 -> conv2 + Sigmoid
    x = upsample2x(x)                                                       # (32, 32, 32, B)
    cols2 = im2col_3x3_chwb(x)                                              # (288, 1024*B) bf16
    rows2 = 1024 * B
    row_tile = next(t for t in (4096, 2048, 1024) if rows2 % t == 0)
    y2 = conv_sigmoid(kp["w2t"], cols2, kp["c2_b"], row_tile=row_tile)      # (3, rows2) f32
    # tiny (3, B*1024) permute back to NCHW
    return y2.reshape(3, 32, 32, B).transpose(3, 0, 1, 2)                   # (B, 3, 32, 32)


def reference_forward(p, z):
    # Pure-JAX f32 reference (mirrors the PyTorch forward, training-mode BN).
    B = z.shape[0]
    x = _leaky_relu(z @ p["fc_w"] + p["fc_b"][None, :])
    x = x.reshape(B, 64, 8, 8).transpose(0, 2, 3, 1)                        # NHWC
    x = upsample2x(x)
    x = lax.conv_general_dilated(x, p["c1_w"], (1, 1), "SAME",
                                 dimension_numbers=("NHWC", "HWIO", "NHWC"))
    x = x + p["c1_b"][None, None, None, :]
    mean = jnp.mean(x, axis=(0, 1, 2), keepdims=True)
    var = jnp.mean((x - mean) ** 2, axis=(0, 1, 2), keepdims=True)
    x = (x - mean) * lax.rsqrt(var + BN_EPS)
    x = x * p["bn_g"][None, None, None, :] + p["bn_b"][None, None, None, :]
    x = _leaky_relu(x)
    x = upsample2x(x)
    x = lax.conv_general_dilated(x, p["c2_w"], (1, 1), "SAME",
                                 dimension_numbers=("NHWC", "HWIO", "NHWC"))
    x = x + p["c2_b"][None, None, None, :]
    return jax.nn.sigmoid(x).transpose(0, 3, 1, 2)                          # NCHW


if __name__ == "__main__":
    n_latent = 32
    B = 2
    key = jax.random.PRNGKey(0)
    kz, kp_key = jax.random.split(key)
    params = init_params(kp_key, n_latent)
    kparams = prepare_params(params)
    z = jax.random.normal(kz, (B, n_latent), jnp.float32)

    out = jax.block_until_ready(generator_forward(kparams, z))
    assert out.shape == (B, 3, 32, 32), out.shape

    ref = reference_forward(params, z)
    max_err = jnp.max(jnp.abs(out - ref))
    assert jnp.allclose(out, ref, atol=2e-2, rtol=2e-2), f"mismatch vs reference, max abs err={max_err}"

    print("KERNEL_OK")
</pallas_src>

<mosaic_0001>
module attributes {stable_mosaic.version = 11 : i64} {
  func.func @fc_kernel(%arg0: i32, %arg1: memref<2x32xbf16, #tpu.memory_space<vmem>>, %arg2: memref<32x2048xbf16, #tpu.memory_space<vmem>>, %arg3: memref<1x2048xf32, #tpu.memory_space<vmem>>, %arg4: memref<2x2048xf32, #tpu.memory_space<vmem>>) attributes {dimension_semantics = [#tpu.dimension_semantics<parallel>], iteration_bounds = array<i64: 2>, scalar_prefetch = 0 : i64, scratch_operands = 0 : i64, tpu.core_type = #tpu.core_type<tc>, window_params = [{pipeline_mode = #tpu.pipeline_mode<synchronous>, transform_indices = @transform_0, window_bounds = array<i64: 2, 32>}, {transform_indices = @transform_1, window_bounds = array<i64: 32, 2048>}, {transform_indices = @transform_2, window_bounds = array<i64: 1, 2048>}, {transform_indices = @transform_3, window_bounds = array<i64: 2, 2048>}]} {
    %c0 = arith.constant 0 : index
    %c0_0 = arith.constant 0 : index
    %0 = vector.load %arg1[%c0, %c0_0] : memref<2x32xbf16, #tpu.memory_space<vmem>>, vector<2x32xbf16>
    %c0_1 = arith.constant 0 : index
    %c0_2 = arith.constant 0 : index
    %1 = vector.load %arg2[%c0_1, %c0_2] : memref<32x2048xbf16, #tpu.memory_space<vmem>>, vector<32x2048xbf16>
    %cst = arith.constant dense<0.000000e+00> : vector<2x2048xf32>
    %2 = tpu.matmul %0, %1, %cst {dimension_numbers = #tpu.dot_dimension_numbers<[1], [0], [0], [1], [0, 0, 1, 1], [], []>} : vector<2x32xbf16>, vector<32x2048xbf16>, vector<2x2048xf32> -> vector<2x2048xf32>
    %c0_3 = arith.constant 0 : index
    %c0_4 = arith.constant 0 : index
    %3 = vector.load %arg3[%c0_3, %c0_4] : memref<1x2048xf32, #tpu.memory_space<vmem>>, vector<1x2048xf32>
    %4 = vector.broadcast %3 : vector<1x2048xf32> to vector<2x2048xf32>
    %5 = arith.addf %2, %4 : vector<2x2048xf32>
    %cst_5 = arith.constant 0.000000e+00 : f32
    %6 = vector.broadcast %cst_5 : f32 to vector<2x2048xf32>
    %7 = arith.cmpf ogt, %5, %6 : vector<2x2048xf32>
    %cst_6 = arith.constant 0.00999999977 : f32
    %8 = vector.broadcast %cst_6 : f32 to vector<2x2048xf32>
    %9 = arith.mulf %8, %5 : vector<2x2048xf32>
    %10 = arith.select %7, %5, %9 : vector<2x2048xi1>, vector<2x2048xf32>
    %c0_7 = arith.constant 0 : index
    %c0_8 = arith.constant 0 : index
    %11 = vector.load %arg4[%c0_7, %c0_8] : memref<2x2048xf32, #tpu.memory_space<vmem>>, vector<2x2048xf32>
    tpu.vector_store %arg4[%c0_7, %c0_8], %10 {strides = array<i32>} : memref<2x2048xf32, #tpu.memory_space<vmem>>, vector<2x2048xf32>,
    return
  }
  func.func @transform_0(%arg0: i32) -> (i32, i32) {
    %c0_i32 = arith.constant 0 : i32
    %c0_i32_0 = arith.constant 0 : i32
    %c0_i32_1 = arith.constant 0 : i32
    return %c0_i32, %c0_i32_0 : i32, i32
  }
  func.func @transform_1(%arg0: i32) -> (i32, i32) {
    %c0_i32 = arith.constant 0 : i32
    %c0_i32_0 = arith.constant 0 : i32
    return %c0_i32, %arg0 : i32, i32
  }
  func.func @transform_2(%arg0: i32) -> (i32, i32) {
    %c0_i32 = arith.constant 0 : i32
    %c0_i32_0 = arith.constant 0 : i32
    return %c0_i32, %arg0 : i32, i32
  }
  func.func @transform_3(%arg0: i32) -> (i32, i32) {
    %c0_i32 = arith.constant 0 : i32
    %c0_i32_0 = arith.constant 0 : i32
    return %c0_i32, %arg0 : i32, i32
  }
}

</mosaic_0001>

<bundles_post_ra>
// kernel: tpu_custom_call.1
= control target key start
LH: loop header
LB: loop body
LE: loop exit
PB: predicated region body
PF: predicated region fallthrough
CT: control target
= control target key end

     0   :  { %8 = vsyncpa [#allocation3], 0  ;;  %s1764_s0 = inlined_call_operand.hbm [shape: bf16[2,32], index: 0, kind: input, shape index: {}]   ;;  %s1765_s1 = inlined_call_operand.hbm [shape: bf16[32,4096], index: 1, kind: input, shape index: {}]   ;;  %s1766_s2 = inlined_call_operand.hbm [shape: f32[1,4096], index: 2, kind: input, shape index: {}]   ;;  %s1767_s3 = inlined_call_operand.hbm [shape: f32[2,4096], index: 3, kind: output, shape index: {}]  }
   0x1   :  { %9 = vsyncpa [#allocation6], 0 }
   0x2   :  { %11 = vsyncpa [#allocation6 + $0x1], 0 }
   0x3   :  { %12 = vsyncpa [#allocation4], 0 }
   0x4   :  { %14 = vsyncpa [#allocation4 + $0x1], 0  ;;  %s1418_s12 = smov 0   ;;  %s1420_s13 = smov 0  }
   0x5   :  { %s1422_s14 = smov 0   ;;  %s1424_s15 = smov 0  }
   0x6 LB: > { %s1439_s16 = sadd.s32 1, %s1387_s15   ;;  %s48_s17 = sadd.s32 1, %s1383_s14  ;;  %s1387_s15 = sphi %s1424_s15, %s1789_s15   ;;  %s1383_s14 = sphi %s1422_s14, %s1788_s14   ;;  %s1379_s13 = sphi %s1420_s13, %s1787_s13   ;;  %s1375_s12 = sphi %s1418_s12, %s1786_s12  }
   0x7   : > { %s45_s18 = ssub.s32 %s1387_s15, %s1439_s16  ;;  %p55_p0 = scmp.ne.s32.totalorder %s1383_s14, %s1379_s13 }
   0x8   : > { %p46_p1 = scmp.eq.s32.totalorder %s45_s18, 0  ;;  %p56_p2 = scmp.eq.s32.totalorder %s1387_s15, 0 }
   0x9   : > { %p1196_p4 = scmp.lt.s32.totalorder %s1387_s15, 2  ;;  %s148_s20 = sand.u32 1, %s1387_s15  }
   0xa   : > { %s1450_s19 = scalar_select %p46_p1, %s1383_s14, %s48_s17  }
   0xb   : > { %p57_p5 = por %p56_p2, %p55_p0  ;;  %s150_s21 = sand.u32 1, %s1383_s14  }
   0xc   : > { %s1111_s22 = sshll.u32 %s150_s21, 8  ;;  %s1167_s23 = sshll.u32 %s1387_s15, 10 }
   0xd   : > { %s1463_s26 = scalar_lea.hbm %s1765_s1, %s1167_s23  ;;  %s152_s27 = scalar_lea.vmem [#allocation5], %s1111_s22 }
   0xe   : > { %s159_s28 = sshll.u32 %s152_s27, 4  ;;  %p1465_p6 = pnand %p1196_p4, %p57_p5  ;;  %s1469_s28 = int_to_ptr.vmem [resolvable:$true] %s159_s28 }
   0xf   : > { %s1471_s30 = scalar_lea.sflag [#allocation6], %s148_s20  ;;  %s1237_s4 = scalar_lea.hbm %s1463_s26, 4096 }
  0x10   : > { %p1238_p7 = scmp.ne.s32.totalorder %s1463_s26, %s1237_s4  ;;  %p1769_p8 = pneg %p1465_p6 }
  0x11   : > { %s1242_s7 = scalar_lea.hbm %s1765_s1, 8192  ;;  %p1243_p11 = scmp.lt.s32.totalorder %s1463_s26, %s1765_s1 }
  0x12   : > { %p1240_p9 = pnand %p1769_p8, %p1238_p7  ;;  %p1244_p12 = scmp.lt.s32.totalorder %s1242_s7, %s1237_s4 }
  0x14   : > { %p1241_p10 = pneg %p1240_p9  ;;  %p1245_p13 = por %p1244_p12, %p1243_p11 }
  0x16   : > { %p1246_p1 = pnand %p1245_p13, %p1241_p10 }
  0x18   : > { %1249 = shalt.err (!%p1246_p1)
}
  0x19   : > { %s1250_s10 = scalar_lea.vmem %s1469_s28, 4096  ;;  %s1389_s11 = smov [#allocation5]  }
  0x1a   : > { %p1251_p2 = scmp.ne.s32.totalorder %s1469_s28, %s1250_s10  ;;  %s1255_s17 = sshll.u32 %s1389_s11, 4  ;;  %s1256_s17 = int_to_ptr.vmem [resolvable:$false] %s1255_s17 }
  0x1b   : > { %s1257_s18 = scalar_lea.vmem %s1256_s17, 8192  ;;  %p1258_p7 = scmp.lt.s32.totalorder %s1469_s28, %s1256_s17 }
  0x1c   : > { %p1253_p4 = pnand %p1251_p2, %p1769_p8  ;;  %p1259_p9 = scmp.lt.s32.totalorder %s1257_s18, %s1250_s10 }
  0x1e   : > { %p1254_p5 = pneg %p1253_p4  ;;  %p1260_p3 = por %p1259_p9, %p1258_p7 }
  0x20   : > { %p1261_p11 = pnand %p1260_p3, %p1254_p5 }
  0x22   : > { %1264 = shalt.err (!%p1261_p11)
}
  0x23   : > { %s1390_s20 = smov 2048   ;;  %s1391_s22 = smov 1024  }
  0x24   : > { %s1392_s23 = smov 64   ;;  %s1499_s24 = sadd.s32 4294967295, %s1387_s15  }
  0x25   : > { %1187 = dma.hbm_to_vmem [thread:$0]  (!%p1465_p6), %s1463_s26, 4096, %s1469_s28, %s1471_s30, %s1390_s20, %s1391_s22, %s1392_s23  }
  0x26   : > { %s1107_s25 = sadd.s32 4294967294, %s1387_s15   ;;  %p61_p3 = scmp.ne.s32.totalorder %s1379_s13, %s1375_s12 }
  0x27   : > { %p1768_p10 = scmp.eq.s32.totalorder %s1499_s24, 0  ;;  %p111_p12 = scmp.eq.s32.totalorder %s1499_s24, 1 }
  0x28   : > { %p117_p13 = scmp.eq.s32.totalorder %s1107_s25, 1  ;;  %p1108_p1 = scmp.ge.s32.totalorder %s1387_s15, 1 }
  0x29   : > { %p1509_p2 = por %p1768_p10, %p61_p3  ;;  %p1516_p4 = por %p111_p12, %p55_p0 }
  0x2a   : > { %p1520_p5 = por %p117_p13, %p61_p3  ;;  %p124_p7 = scmp.lt.s32.totalorder %s1387_s15, 3 }
  0x2b   : > { %s1773_s27 = scalar_select %p1509_p2, 1, 0 }
  0x2c   : > { %s1774_s26 = scalar_select %p1516_p4, 1, 0 }
  0x2d   : > { %s1775_s28 = scalar_select %p1520_p5, 1, 0 }
  0x2e   : > { %p1525_p9 = pnand %p1108_p1, %p124_p7  ;;  %s1393_s5 = smov [#allocation2]  }
  0x2f   : > { %s137_s6 = sshll.u32 %s1393_s5, 4  ;;  %s1114_s7 = sshll.u32 %s150_s21, 4  ;;  %s138_s6 = int_to_ptr.vmem [resolvable:$true] %s137_s6 }
  0x30   : > { %p1180_p11 = pneg %p1525_p9  ;;  %s1168_s8 = sshll.u32 %s1387_s15, 8 }
  0x31   : > { %s173_s9 = scalar_lea.vmem [#allocation7], %s1114_s7  ;;  %s1543_s20 = scalar_lea.hbm %s1766_s2, %s1168_s8 }
  0x32   : > { %s181_s10 = sshll.u32 %s173_s9, 4  ;;  %p1536_p0 = pnand %p1180_p11, %p1768_p10  ;;  %s1545_s10 = int_to_ptr.vmem [resolvable:$true] %s181_s10 }
  0x33   : > { %s1276_s21 = scalar_lea.vmem %s138_s6, 16  ;;  %s1283_s22 = scalar_lea.vmem %s138_s6, 32 }
  0x34   : > { %p1267_p3 = pneg %p1536_p0  ;;  %p1277_p12 = scmp.ne.s32.totalorder %s138_s6, %s1276_s21 }
  0x35   : > { %p1284_p7 = scmp.lt.s32.totalorder %s138_s6, %s138_s6  ;;  %p1285_p11 = scmp.lt.s32.totalorder %s1283_s22, %s1276_s21 }
  0x36   : > { %p1279_p13 = pnand %p1277_p12, %p1267_p3 }
  0x37   : > { %p1286_p10 = por %p1285_p11, %p1284_p7 }
  0x38   : > { %p1280_p1 = pneg %p1279_p13 }
  0x3a   : > { %p1287_p8 = pnand %p1286_p10, %p1280_p1 }
  0x3c   : > { %1290 = shalt.err (!%p1287_p8)
}
  0x3d   : > { %1183 = dma.hbm_to_vmem [thread:$0]  (!%p1536_p0), %s1764_s0, 16, %s138_s6, [#allocation3]  }
  0x3e   : > { %s1291_s5 = scalar_lea.hbm %s1543_s20, 256  ;;  %p1778_p3 = pneg %p1465_p6 }
  0x3f   : > { %p1292_p5 = scmp.ne.s32.totalorder %s1543_s20, %s1291_s5  ;;  %s1296_s9 = scalar_lea.hbm %s1766_s2, 512 }
  0x40   : > { %p1297_p8 = scmp.lt.s32.totalorder %s1543_s20, %s1766_s2  ;;  %p1298_p10 = scmp.lt.s32.totalorder %s1296_s9, %s1291_s5 }
  0x41   : > { %p1294_p12 = pnand %p1292_p5, %p1778_p3 }
  0x42   : > { %p1299_p1 = por %p1298_p10, %p1297_p8 }
  0x43   : > { %p1295_p13 = pneg %p1294_p12 }
  0x45   : > { %p1300_p7 = pnand %p1299_p1, %p1295_p13 }
  0x47   : > { %1303 = shalt.err (!%p1300_p7)
}
  0x48   : > { %s1304_s6 = scalar_lea.vmem %s1545_s10, 256  ;;  %p1779_p5 = pmov %p1778_p3 }
  0x49   : > { %p1305_p0 = scmp.ne.s32.totalorder %s1545_s10, %s1304_s6  ;;  %s1394_s18 = smov [#allocation7]  }
  0x4a   : > { %s1309_s21 = sshll.u32 %s1394_s18, 4  ;;  %s1310_s21 = int_to_ptr.vmem [resolvable:$false] %s1309_s21 }
  0x4b   : > { %p1307_p11 = pnand %p1305_p0, %p1779_p5  ;;  %s1311_s22 = scalar_lea.vmem %s1310_s21, 512 }
  0x4c   : > { %p1312_p12 = scmp.lt.s32.totalorder %s1545_s10, %s1310_s21  ;;  %p1313_p4 = scmp.lt.s32.totalorder %s1311_s22, %s1304_s6 }
  0x4d   : > { %p1308_p3 = pneg %p1307_p11 }
  0x4e   : > { %p1314_p2 = por %p1313_p4, %p1312_p12 }
  0x50   : > { %p1315_p8 = pnand %p1314_p2, %p1308_p3 }
  0x52   : > { %1318 = shalt.err (!%p1315_p8)
}
  0x53   : > { %1190 = dma.hbm_to_vmem [thread:$0]  (!%p1465_p6), %s1543_s20, 256, %s1545_s10, %s1471_s30  }
  0x54   : > { %190 = sbr.rel (%p1525_p9) target bundleno = 351 (0x15f), region = 32  ;;  %p1780_p13 = scmp.eq.s32.totalorder (!%p1525_p9), %s1499_s24, 0 }
  0x59   : > { %1362 = dma.done.wait (%p1780_p13), [#allocation3], 16   ;;  %p1781_p10 = pmov %p1780_p13 }
  0x5a   : > { %s196_s23 = sand.u32 1, %s1499_s24   ;;  %s1585_s25 = sand.u32 1, %s1379_s13  }
  0x5b   : > { %1364 = vsyncadd (%p1781_p10), [#allocation3], 4294967280  ;;  %s1119_s29 = sshll.u32 %s1585_s25, 8  ;;  %s197_s5 = scalar_lea.sflag [#allocation6], %s196_s23 }
  0x5c   : > { %s1588_s7 = scalar_lea.vmem [#allocation5], %s1119_s29  ;;  %p1782_p6 = scmp.ne.s32.totalorder %s1773_s27, 0 }
  0x5e   : > { %1366 = dma.done.wait (%p1782_p6), %s197_s5, 4352  }
  0x5f   : > { %1368 = vsyncadd (%p1782_p6), %s197_s5, 4294962944  ;;  %v1395_v0 = vmov 0   ;;  %v258_v1 = vld [vmem:[%s1588_s7 + $0x80] sm:$0xff]  ;;  %v259_v3 = vld [vmem:[%s1588_s7 + $0x88] sm:$0xff]  ;;  %vm518_vm0 = vcmask 261120   ;;  %s1120_s30 = sshll.u32 %s1585_s25, 4 }
  0x60   : > { %554 = vmatprep.mubr.bf16.mxu0 %v1395_v0  ;;  %595 = vmatprep.mubr.bf16.mxu1 %v1395_v0  ;;  %v266_v2 = vld [vmem:[%s1588_s7 + $0xc0] sm:$0xff]  ;;  %v267_v5 = vld [vmem:[%s1588_s7 + $0xc8] sm:$0xff]  ;;  %v260_v15 = vld [vmem:[%s1588_s7 + $0x90] sm:$0xff]  ;;  %s1656_s27 = scalar_lea.vmem [#allocation7], %s1120_s30  ;;  %s1121_s4 = sshll.u32 %s1585_s25, 5 }
  0x61   : > { %v1139_v4 = vcombine.high %v258_v1, %v266_v2  ;;  %v1138_v6 = vcombine.low %v258_v1, %v266_v2  ;;  %v242_v7 = vld [vmem:[%s1588_s7] sm:$0xff]  ;;  %v1141_v9 = vcombine.high %v259_v3, %v267_v5  ;;  %v1140_v10 = vcombine.low %v259_v3, %v267_v5  ;;  %v243_v12 = vld [vmem:[%s1588_s7 + $0x8] sm:$0xff]  ;;  %v268_v16 = vld [vmem:[%s1588_s7 + $0xd0] sm:$0xff]  ;;  %s1697_s10 = scalar_lea.vmem [#allocation8], %s1121_s4  ;;  %s1169_s20 = sshll.u32 %s1499_s24, 9 }
  0x62   : > { %v250_v8 = vld [vmem:[%s1588_s7 + $0x40] sm:$0xff]  ;;  %v251_v13 = vld [vmem:[%s1588_s7 + $0x48] sm:$0xff]  ;;  %v261_v17 = vld [vmem:[%s1588_s7 + $0x98] sm:$0xff]  ;;  %v1143_v21 = vcombine.high %v260_v15, %v268_v16  ;;  %v1142_v28 = vcombine.low %v260_v15, %v268_v16  ;;  %v278_v3 = vlaneseq  ;;  %s1005_s8 = sshll.u32 %s1697_s10, 4  ;;  %s1003_s11 = scalar_lea.hbm %s1767_s3, %s1169_s20  ;;  %s1006_s8 = int_to_ptr.vmem [resolvable:$true] %s1005_s8 }
  0x63   : > { %v1123_v11 = vcombine.high %v242_v7, %v250_v8  ;;  %534 = vmatprep.subr.bf16.mxu0 %v1139_v4  ;;  %v1125_v14 = vcombine.high %v243_v12, %v251_v13  ;;  %575 = vmatprep.subr.bf16.mxu1 %v1141_v9  ;;  %v1122_v18 = vcombine.low %v242_v7, %v250_v8  ;;  %v269_v19 = vld [vmem:[%s1588_s7 + $0xd8] sm:$0xff]  ;;  %v244_v23 = vld [vmem:[%s1588_s7 + $0x10] sm:$0xff]  ;;  %v262_v32 = vld [vmem:[%s1588_s7 + $0xa0] sm:$0xff]  ;;  %s991_s6 = scalar_lea.sflag [#allocation4], %s1585_s25  ;;  %s1319_s18 = scalar_lea.vmem %s1006_s8, 512 }
  0x64   : > { %535 = vmatpush1.bf16.msra.mxu0 %v1138_v6  ;;  %576 = vmatpush1.bf16.msra.mxu1 %v1140_v10  ;;  %v1124_v20 = vcombine.low %v243_v12, %v251_v13  ;;  %v1145_v22 = vcombine.high %v261_v17, %v269_v19  ;;  %v252_v24 = vld [vmem:[%s1588_s7 + $0x50] sm:$0xff]  ;;  %v245_v25 = vld [vmem:[%s1588_s7 + $0x18] sm:$0xff]  ;;  %v1144_v29 = vcombine.low %v261_v17, %v269_v19  ;;  %v270_v33 = vld [vmem:[%s1588_s7 + $0xe0] sm:$0xff]  ;;  %v1653_v4 = vshrl.u32 %v278_v3, 7  ;;  %p1320_p2 = scmp.ne.s32.totalorder %s1006_s8, %s1319_s18  ;;  %p1783_p4 = scmp.ne.s32.totalorder %s1774_s26, 0 }
  0x65   : > { %536 = vmatprep.subr.bf16.mxu0 %v1123_v11  ;;  %577 = vmatprep.subr.bf16.mxu1 %v1125_v14  ;;  %v253_v26 = vld [vmem:[%s1588_s7 + $0x58] sm:$0xff]  ;;  %v1127_v30 = vcombine.high %v244_v23, %v252_v24  ;;  %v263_v34 = vld [vmem:[%s1588_s7 + $0xa8] sm:$0xff]  ;;  %v1126_v36 = vcombine.low %v244_v23, %v252_v24  ;;  %v1147_v38 = vcombine.high %v262_v32, %v270_v33  ;;  %v246_v40 = vld [vmem:[%s1588_s7 + $0x20] sm:$0xff]  ;;  %v1396_v11 = vmov 1983009808   ;;  %s1397_s21 = smov [#allocation8]  }
  0x66   : > { %v1612_v27 = vld [vmem:[#allocation2] sm:$0x1]  ;;  %v1129_v31 = vcombine.high %v245_v25, %v253_v26  ;;  %v271_v35 = vld [vmem:[%s1588_s7 + $0xe8] sm:$0xff]  ;;  %v1128_v37 = vcombine.low %v245_v25, %v253_v26  ;;  %v254_v41 = vld [vmem:[%s1588_s7 + $0x60] sm:$0xff]  ;;  %v1146_v44 = vcombine.low %v262_v32, %v270_v33  ;;  %v280_v5 = vsub.s32 0, %v1653_v4  ;;  %p1321_p9 = pnand %p1320_p2, %p1783_p4  ;;  %s1323_s22 = sshll.u32 %s1397_s21, 4  ;;  %s1324_s22 = int_to_ptr.vmem [resolvable:$false] %s1323_s22 }
  0x67   : > { %v1149_v39 = vcombine.high %v263_v34, %v271_v35  ;;  %v247_v42 = vld [vmem:[%s1588_s7 + $0x28] sm:$0xff]  ;;  %v1148_v45 = vcombine.low %v263_v34, %v271_v35  ;;  %v1131_v46 = vcombine.high %v246_v40, %v254_v41  ;;  %v264_v48 = vld [vmem:[%s1588_s7 + $0xb0] sm:$0xff]  ;;  %v265_v50 = vld [vmem:[%s1588_s7 + $0xb8] sm:$0xff]  ;;  %v1130_v52 = vcombine.low %v246_v40, %v254_v41  ;;  %s1325_s24 = scalar_lea.vmem %s1324_s22, 1024  ;;  %p1326_p7 = scmp.lt.s32.totalorder %s1006_s8, %s1324_s22 }
  0x68   : > { %537 = vmatpush1.bf16.msra.mxu0 %v1122_v18  ;;  %578 = vmatpush1.bf16.msra.mxu1 %v1124_v20  ;;  %v255_v43 = vld [vmem:[%s1588_s7 + $0x68] sm:$0xff]  ;;  %v272_v49 = vld [vmem:[%s1588_s7 + $0xf0] sm:$0xff]  ;;  %v273_v51 = vld [vmem:[%s1588_s7 + $0xf8] sm:$0xff]  ;;  %v284_v7 = vsub.s32 1, %v1653_v4  ;;  %v292_v8 = vsub.s32 3, %v1653_v4  ;;  %v917_v12 = vunpack.c.l.s4 %v1396_v11  ;;  %v296_v18 = vsub.s32 4, %v1653_v4  ;;  %p1322_p1 = pneg %p1321_p9  ;;  %p1327_p0 = scmp.lt.s32.totalorder %s1325_s24, %s1319_s18 }
  0x69   : > { %616 = vmatprep.subr.bf16.mxu0 %v1143_v21  ;;  %657 = vmatprep.subr.bf16.mxu1 %v1145_v22  ;;  %v1133_v47 = vcombine.high %v247_v42, %v255_v43  ;;  %v1132_v53 = vcombine.low %v247_v42, %v255_v43  ;;  %v1151_v54 = vcombine.high %v264_v48, %v272_v49  ;;  %v248_v56 = vld [vmem:[%s1588_s7 + $0x30] sm:$0xff]  ;;  %v249_v58 = vld [vmem:[%s1588_s7 + $0x38] sm:$0xff]  ;;  %v304_v22 = vsub.s32 6, %v1653_v4 }
  0x6a   : > { %v1153_v55 = vcombine.high %v265_v50, %v273_v51  ;;  %v256_v57 = vld [vmem:[%s1588_s7 + $0x70] sm:$0xff]  ;;  %v257_v59 = vld [vmem:[%s1588_s7 + $0x78] sm:$0xff]  ;;  %v1150_v60 = vcombine.low %v264_v48, %v272_v49  ;;  %v1152_v61 = vcombine.low %v265_v50, %v273_v51  ;;  %v918_v21 = vunpack.c.0.s8 %v917_v12  ;;  %p1328_p5 = por %p1327_p0, %p1326_p7 }
  0x6b   : > { %1154 = vmatmul.mubr.msk.bf16.vlgmr.msra.gmra.mxu0 %vm518_vm0, %v1612_v27  ;;  %1155 = vmatmul.mubr.msk.bf16.vlgmr.msra.gmra.mxu1 %vm518_vm0, %v1612_v27  ;;  %v1135_v62 = vcombine.high %v248_v56, %v256_v57  ;;  %v1137_v63 = vcombine.high %v249_v58, %v257_v59  ;;  %v1134_v1 = vcombine.low %v248_v56, %v256_v57  ;;  %v274_v6 = vld [vmem:[%s1656_s27] sm:$0xff]  ;;  %v300_v26 = vsub.s32 5, %v1653_v4  ;;  %v1687_v50 = vld [vmem:[%s1656_s27 + $0x8] sm:$0xff] }
  0x6c   : > { %617 = vmatpush1.bf16.msra.mxu0 %v1142_v28  ;;  %658 = vmatpush1.bf16.msra.mxu1 %v1144_v29  ;;  %v1136_v2 = vcombine.low %v249_v58, %v257_v59  ;;  %v281_v9 = vrot.slane %v274_v6, %v280_v5  ;;  %v285_v13 = vrot.slane %v274_v6, %v284_v7  ;;  %p1329_p11 = pnand %p1328_p5, %p1322_p1 }
  0x6d   : > { %618 = vmatprep.subr.bf16.mxu0 %v1127_v30  ;;  %659 = vmatprep.subr.bf16.mxu1 %v1129_v31  ;;  %v293_v15 = vrot.slane %v274_v6, %v292_v8  ;;  %v308_v30 = vsub.s32 7, %v1653_v4  ;;  %v297_v33 = vrot.slane %v274_v6, %v296_v18  ;;  %v1677_v34 = vsub.s32 %v918_v21, %v1653_v4 }
  0x6e   : > { %636 = vmatprep.mubr.bf16.mxu0 %v1395_v0  ;;  %677 = vmatprep.mubr.bf16.mxu1 %v1395_v0  ;;  %v301_v41 = vrot.slane %v274_v6, %v300_v26  ;;  %v317_v11 = vrot.slane %v1687_v50, %v284_v7 }
  0x70   : > { %619 = vmatpush1.bf16.msra.mxu0 %v1126_v36  ;;  %660 = vmatpush1.bf16.msra.mxu1 %v1128_v37  ;;  %v305_v37 = vrot.slane %v274_v6, %v304_v22 }
  0x71   : > { %698 = vmatprep.subr.bf16.mxu0 %v1147_v38  ;;  %739 = vmatprep.subr.bf16.mxu1 %v1149_v39 }
  0x73   : > { %1156 = vmatmul.mubr.msk.bf16.vlgmr.msra.gmra.mxu0 %vm518_vm0, %v1612_v27  ;;  %1157 = vmatmul.mubr.msk.bf16.vlgmr.msra.gmra.mxu1 %vm518_vm0, %v1612_v27 }
  0x74   : > { %699 = vmatpush1.bf16.msra.mxu0 %v1146_v44  ;;  %740 = vmatpush1.bf16.msra.mxu1 %v1148_v45 }
  0x75   : > { %700 = vmatprep.subr.bf16.mxu0 %v1131_v46  ;;  %741 = vmatprep.subr.bf16.mxu1 %v1133_v47  ;;  %v309_v46 = vrot.slane %v274_v6, %v308_v30 }
  0x76   : > { %718 = vmatprep.mubr.bf16.mxu0 %v1395_v0  ;;  %759 = vmatprep.mubr.bf16.mxu1 %v1395_v0 }
  0x78   : > { %701 = vmatpush1.bf16.msra.mxu0 %v1130_v52  ;;  %742 = vmatpush1.bf16.msra.mxu1 %v1132_v53 }
  0x79   : > { %780 = vmatprep.subr.bf16.mxu0 %v1151_v54  ;;  %821 = vmatprep.subr.bf16.mxu1 %v1153_v55 }
  0x7b   : > { %1158 = vmatmul.mubr.msk.bf16.vlgmr.msra.gmra.mxu0 %vm518_vm0, %v1612_v27  ;;  %1159 = vmatmul.mubr.msk.bf16.vlgmr.msra.gmra.mxu1 %vm518_vm0, %v1612_v27 }
  0x7c   : > { %781 = vmatpush1.bf16.msra.mxu0 %v1150_v60  ;;  %822 = vmatpush1.bf16.msra.mxu1 %v1152_v61  ;;  %v313_v61 = vrot.slane %v1687_v50, %v280_v5 }
  0x7d   : > { %782 = vmatprep.subr.bf16.mxu0 %v1135_v62  ;;  %823 = vmatprep.subr.bf16.mxu1 %v1137_v63 }
  0x7e   : > { %800 = vmatprep.mubr.bf16.mxu0 %v1395_v0  ;;  %841 = vmatprep.mubr.bf16.mxu1 %v1395_v0  ;;  %v288_v0 = vsub.s32 2, %v1653_v4 }
  0x80   : > { %783 = vmatpush1.bf16.msra.mxu0 %v1134_v1  ;;  %824 = vmatpush1.bf16.msra.mxu1 %v1136_v2  ;;  %v289_v10 = vrot.slane %v274_v6, %v288_v0  ;;  %v321_v6 = vrot.slane %v1687_v50, %v288_v0  ;;  %v325_v0 = vrot.slane %v1687_v50, %v292_v8 }
  0x81   : > { %v329_v8 = vrot.slane %v1687_v50, %v296_v18  ;;  %v333_v18 = vrot.slane %v1687_v50, %v300_v26 }
  0x83   : > { %1160 = vmatmul.mubr.msk.bf16.vlgmr.msra.gmra.mxu0 %vm518_vm0, %v1612_v27  ;;  %1161 = vmatmul.mubr.msk.bf16.vlgmr.msra.gmra.mxu1 %vm518_vm0, %v1612_v27 }
 0x12b   : > { %v556_v14 = vpop.f32.mrf.mxu0  ;;  %v597_v17 = vpop.f32.mrf.mxu1 }
 0x12c   : > { %v557_v16 = vadd.f32 %v556_v14, %v281_v9  ;;  %v598_v19 = vadd.f32 %v597_v17, %v289_v10 }
 0x12d   : > { %v558_v20 = vpop.f32.mrf.mxu0  ;;  %v599_v25 = vpop.f32.mrf.mxu1 }
 0x12e   : > { %v866_v23 = vmul.f32 0.01, %v557_v16  ;;  %v559_v24 = vadd.f32 %v558_v20, %v285_v13  ;;  %vm850_vm1 = vcmp.gt.f32.partialorder %v557_v16, 0.0  ;;  %v868_v27 = vmul.f32 0.01, %v598_v19 }
 0x12f   : > { %v600_v28 = vadd.f32 %v599_v25, %v293_v15  ;;  %v560_v29 = vpop.f32.mrf.mxu0  ;;  %vm852_vm2 = vcmp.gt.f32.partialorder %v598_v19, 0.0  ;;  %v601_v32 = vpop.f32.mrf.mxu1 }
 0x130   : > { %vm851_vm3 = vcmp.gt.f32.partialorder %v559_v24, 0.0  ;;  %v867_v31 = vmul.f32 0.01, %v559_v24  ;;  %v882_v38 = vsel %vm850_vm1, %v557_v16, %v866_v23  ;;  %v884_v42 = vsel %vm852_vm2, %v598_v19, %v868_v27 }
 0x131   : > { %vm853_vm4 = vcmp.gt.f32.partialorder %v600_v28, 0.0  ;;  %v869_v35 = vmul.f32 0.01, %v600_v28  ;;  %v561_v36 = vpop.f32.mrf.mxu0  ;;  %v602_v40 = vpop.f32.mrf.mxu1 }
 0x132   : > { %v883_v39 = vsel %vm851_vm3, %v559_v24, %v867_v31 }
 0x133   : > { %v914_v43 = vcombine.low %v882_v38, %v883_v39  ;;  %v885_v44 = vsel %vm853_vm4, %v600_v28, %v869_v35  ;;  %v638_v45 = vpop.f32.mrf.mxu0  ;;  %v679_v49 = vpop.f32.mrf.mxu1  ;;  %v337_v38 = vrot.slane %v1687_v50, %v304_v22 }
 0x134   : > { %v915_v47 = vcombine.low %v884_v42, %v885_v44  ;;  %v639_v48 = vadd.f32 %v638_v45, %v297_v33  ;;  %v680_v52 = vadd.f32 %v679_v49, %v305_v37 }
 0x135   : > { %v922_v51 = vrot.slane %v914_v43, %v1677_v34  ;;  %v640_v53 = vpop.f32.mrf.mxu0  ;;  %v681_v57 = vpop.f32.mrf.mxu1 }
 0x136   : > { %v929_v54 = vrot.slane %v915_v47, %v1677_v34  ;;  %v870_v55 = vmul.f32 0.01, %v639_v48  ;;  %v641_v56 = vadd.f32 %v640_v53, %v301_v41  ;;  %vm854_vm5 = vcmp.gt.f32.partialorder %v639_v48, 0.0 }
 0x137   : > { %v872_v58 = vmul.f32 0.01, %v680_v52  ;;  %v682_v59 = vadd.f32 %v681_v57, %v309_v46  ;;  %v642_v60 = vpop.f32.mrf.mxu0  ;;  %vm856_vm6 = vcmp.gt.f32.partialorder %v680_v52, 0.0  ;;  %v683_v1 = vpop.f32.mrf.mxu1  ;;  %v341_v46 = vrot.slane %v1687_v50, %v308_v30 }
 0x138   : > { %v930_v62 = vcombine.low %v922_v51, %v929_v54  ;;  %vm855_vm7 = vcmp.gt.f32.partialorder %v641_v56, 0.0  ;;  %v871_v63 = vmul.f32 0.01, %v641_v56  ;;  %v886_v9 = vsel %vm854_vm5, %v639_v48, %v870_v55 }
 0x139   : > { %vm857_vm8 = vcmp.gt.f32.partialorder %v682_v59, 0.0  ;;  %v873_v2 = vmul.f32 0.01, %v682_v59  ;;  %v643_v3 = vpop.f32.mrf.mxu0  ;;  %v684_v5 = vpop.f32.mrf.mxu1  ;;  %v888_v12 = vsel %vm856_vm6, %v680_v52, %v872_v58 }
 0x13a   : > { %986 = vst [vmem:[%s1697_s10] sm:$0xff] %v930_v62  ;;  %v887_v10 = vsel %vm855_vm7, %v641_v56, %v871_v63 }
 0x13b   : > { %v931_v13 = vcombine.low %v886_v9, %v887_v10  ;;  %v889_v14 = vsel %vm857_vm8, %v682_v59, %v873_v2  ;;  %v720_v15 = vpop.f32.mrf.mxu0  ;;  %v761_v19 = vpop.f32.mrf.mxu1 }
 0x13c   : > { %v932_v16 = vcombine.low %v888_v12, %v889_v14  ;;  %v721_v17 = vadd.f32 %v720_v15, %v313_v61  ;;  %v762_v21 = vadd.f32 %v761_v19, %v321_v6 }
 0x13d   : > { %v939_v20 = vrot.slane %v931_v13, %v1677_v34  ;;  %v722_v23 = vpop.f32.mrf.mxu0  ;;  %v763_v7 = vpop.f32.mrf.mxu1 }
 0x13e   : > { %v946_v24 = vrot.slane %v932_v16, %v1677_v34  ;;  %v874_v25 = vmul.f32 0.01, %v721_v17  ;;  %v723_v27 = vadd.f32 %v722_v23, %v317_v11  ;;  %vm858_vm9 = vcmp.gt.f32.partialorder %v721_v17, 0.0 }
 0x13f   : > { %v876_v28 = vmul.f32 0.01, %v762_v21  ;;  %v764_v29 = vadd.f32 %v763_v7, %v325_v0  ;;  %v724_v31 = vpop.f32.mrf.mxu0  ;;  %vm860_vm10 = vcmp.gt.f32.partialorder %v762_v21, 0.0  ;;  %v765_v35 = vpop.f32.mrf.mxu1 }
 0x140   : > { %v947_v32 = vcombine.low %v939_v20, %v946_v24  ;;  %vm859_vm11 = vcmp.gt.f32.partialorder %v723_v27, 0.0  ;;  %v875_v33 = vmul.f32 0.01, %v723_v27  ;;  %v890_v39 = vsel %vm858_vm9, %v721_v17, %v874_v25 }
 0x141   : > { %vm861_vm12 = vcmp.gt.f32.partialorder %v764_v29, 0.0  ;;  %v877_v36 = vmul.f32 0.01, %v764_v29  ;;  %v725_v37 = vpop.f32.mrf.mxu0  ;;  %v766_v41 = vpop.f32.mrf.mxu1  ;;  %v892_v42 = vsel %vm860_vm10, %v762_v21, %v876_v28 }
 0x142   : > { %987 = vst [vmem:[%s1697_s10 + $0x8] sm:$0xff] %v947_v32  ;;  %v891_v40 = vsel %vm859_vm11, %v723_v27, %v875_v33 }
 0x143   : > { %v948_v43 = vcombine.low %v890_v39, %v891_v40  ;;  %v893_v44 = vsel %vm861_vm12, %v764_v29, %v877_v36  ;;  %v802_v45 = vpop.f32.mrf.mxu0  ;;  %v843_v49 = vpop.f32.mrf.mxu1 }
 0x144   : > { %v949_v47 = vcombine.low %v892_v42, %v893_v44  ;;  %v803_v48 = vadd.f32 %v802_v45, %v329_v8  ;;  %v844_v51 = vadd.f32 %v843_v49, %v337_v38 }
 0x145   : > { %v956_v22 = vrot.slane %v948_v43, %v1677_v34  ;;  %v804_v52 = vpop.f32.mrf.mxu0  ;;  %v845_v55 = vpop.f32.mrf.mxu1 }
 0x146   : > { %v963_v53 = vrot.slane %v949_v47, %v1677_v34  ;;  %v878_v54 = vmul.f32 0.01, %v803_v48  ;;  %v805_v26 = vadd.f32 %v804_v52, %v333_v18  ;;  %vm862_vm13 = vcmp.gt.f32.partialorder %v803_v48, 0.0 }
 0x147   : > { %v880_v56 = vmul.f32 0.01, %v844_v51  ;;  %v846_v57 = vadd.f32 %v845_v55, %v341_v46  ;;  %v806_v58 = vpop.f32.mrf.mxu0  ;;  %vm864_vm14 = vcmp.gt.f32.partialorder %v844_v51, 0.0  ;;  %v847_v50 = vpop.f32.mrf.mxu1 }
 0x148   : > { %v964_v4 = vcombine.low %v956_v22, %v963_v53  ;;  %vm863_vm15 = vcmp.gt.f32.partialorder %v805_v26, 0.0  ;;  %v879_v30 = vmul.f32 0.01, %v805_v26  ;;  %v894_v61 = vsel %vm862_vm13, %v803_v48, %v878_v54 }
 0x149   : > { %vm865_vm0 = vcmp.gt.f32.partialorder %v846_v57, 0.0  ;;  %v881_v59 = vmul.f32 0.01, %v846_v57  ;;  %v807_v60 = vpop.f32.mrf.mxu0  ;;  %v848_v63 = vpop.f32.mrf.mxu1  ;;  %v896_v1 = vsel %vm864_vm14, %v844_v51, %v880_v56 }
 0x14a   : > { %988 = vst [vmem:[%s1697_s10 + $0x10] sm:$0xff] %v964_v4  ;;  %v895_v62 = vsel %vm863_vm15, %v805_v26, %v879_v30 }
 0x14b   : > { %v965_v2 = vcombine.low %v894_v61, %v895_v62  ;;  %v897_v3 = vsel %vm865_vm0, %v846_v57, %v881_v59 }
 0x14c   : > { %v966_v6 = vcombine.low %v896_v1, %v897_v3 }
 0x14d   : > { %v973_v9 = vrot.slane %v965_v2, %v1677_v34 }
 0x14e   : > { %v980_v10 = vrot.slane %v966_v6, %v1677_v34 }
 0x150   : > { %v981_v5 = vcombine.low %v973_v9, %v980_v10 }
 0x152   : > { %989 = vst [vmem:[%s1697_s10 + $0x18] sm:$0xff] %v981_v5 }
 0x153   : > { %1332 = shalt.err (!%p1329_p11)
}
 0x154   : > { %s1333_s23 = scalar_lea.hbm %s1003_s11, 512  ;;  %s1337_s5 = scalar_lea.hbm %s1767_s3, 1024 }
 0x155   : > { %p1334_p3 = scmp.ne.s32.totalorder %s1003_s11, %s1333_s23  ;;  %p1338_p13 = scmp.lt.s32.totalorder %s1003_s11, %s1767_s3 }
 0x156   : > { %p1339_p10 = scmp.lt.s32.totalorder %s1337_s5, %s1333_s23 }
 0x157   : > { %p1335_p12 = pnand %p1334_p3, %p1783_p4 }
 0x158   : > { %p1340_p6 = por %p1339_p10, %p1338_p13 }
 0x159   : > { %p1336_p8 = pneg %p1335_p12 }
 0x15b   : > { %p1341_p2 = pnand %p1340_p6, %p1336_p8 }
 0x15d   : > { %1344 = shalt.err (!%p1341_p2)
}
 0x15e   : > { %1178 = dma.vmem_to_hbm [thread:$0]  (%p1783_p4), %s1006_s8, 512, %s1003_s11, %s991_s6  }
 0x15f PF: > { %s1017_s27 = sand.u32 1, %s1375_s12   ;;  %p1784_p9 = scmp.ne.s32.totalorder %s1775_s28, 0 }
 0x160   : > { %p1785_p1 = scmp.ge.s32.totalorder %s1387_s15, 2  ;;  %s1018_s4 = scalar_lea.sflag [#allocation4], %s1017_s27 }
 0x162   : > { %p1192_p7 = pnand %p1785_p1, %p1784_p9 }
 0x164   : > { %p1193_p0 = pneg %p1192_p7 }
 0x166   : > { %1370 = dma.done.wait (%p1193_p0), %s1018_s4, 512  }
 0x167   : > { %1372 = vsyncadd (%p1193_p0), %s1018_s4, 4294966784  ;;  %p17_p5 = scmp.ge.s32.totalorder %s1439_s16, 4   ;;  %s1786_s12 = smov %s1379_s13 }
 0x168   : > { %s1787_s13 = smov %s1383_s14  ;;  %s1788_s14 = smov %s1450_s19 }
 0x169   : > { %s1789_s15 = smov %s1439_s16  ;;  %19 = sbr.rel (!%p17_p5) target bundleno = 6 (0x6), region = 93 }
 0x16e   :  { %1023 = vsyncpa [#allocation3], 1 }
 0x16f   :  { %1025 = vsyncpa [#allocation3 + $0x1], 1 }
 0x170   :  { %1026 = vsyncpa [#allocation6], 1 }
 0x171   :  { %1028 = vsyncpa [#allocation6 + $0x1], 1 }
 0x172   :  { %1029 = vsyncpa [#allocation4], 1 }
 0x173   :  { %1031 = vsyncpa [#allocation4 + $0x1], 1 }

</bundles_post_ra>
